<compile_context>
chip_gen: v7x
topology: tpu7x:2x2x1
jax: 0.10.0
libtpu: 0.0.40
codegen_flags: <defaults>
</compile_context>

<pallas_src>
import jax
import jax.numpy as jnp
from jax.experimental import pallas as pl
from jax.experimental.pallas import tpu as pltpu


def _focus_conv_kernel(x_ref, w_ref, scale_ref, bias_ref, o_ref):
    """One (N, TM) output tile of the fused 1x1-conv + BN + SiLU.

    x_ref:     (K, TM)  space-to-depth activations, channel-major (spatial on lanes)
    w_ref:     (N, K)   1x1 conv weight
    scale_ref: (N, 1)   fused BatchNorm scale  (gamma / sqrt(var + eps))
    bias_ref:  (N, 1)   fused BatchNorm bias   (beta - mean * scale)
    o_ref:     (N, TM)  output tile (lane-dense)
    """
    acc = jnp.dot(w_ref[...], x_ref[...], preferred_element_type=jnp.float32)
    y = acc * scale_ref[...] + bias_ref[...]                    # BN affine (f32)
    o_ref[...] = (y * jax.nn.sigmoid(y)).astype(o_ref.dtype)    # SiLU


def focus_forward(x, w_nk, bn_scale, bn_bias, *, m_tile=2048):
    """YOLOX Focus forward.

    x:        (B, C, H, W) NCHW input
    w_nk:     (N, 4*C)     1x1 conv weight (torch (N, 4C, 1, 1) squeezed)
    bn_scale: (N,)         fused BN scale
    bn_bias:  (N,)         fused BN bias
    returns   (B, N, H//2, W//2) NCHW
    """
    B, C, H, W = x.shape
    N, K = w_nk.shape
    assert K == 4 * C, (K, C)
    Hh, Wh = H // 2, W // 2
    M = Hh * Wh

    # --- space-to-depth: the only pre-kernel copy (same order as PyTorch Focus) ---
    tl = x[..., ::2, ::2]
    tr = x[..., ::2, 1::2]
    bl = x[..., 1::2, ::2]
    br = x[..., 1::2, 1::2]
    xc = jnp.concatenate([tl, bl, tr, br], axis=1)      # (B, 4C, Hh, Wh)
    x_km = xc.reshape(B, K, M)                          # free contiguous reshape
    # TODO(synk): pull the stride-2 space-to-depth gather into the kernel (manual
    # strided DMA on H/W with memory_space=pl.ANY) so xc is never materialized in HBM.

    # Align K to the f32 sublane width (zero pad: contributes nothing to the dot).
    w_use = w_nk
    Kp = K
    if K % 8 != 0:
        pad = (-K) % 8
        x_km = jnp.pad(x_km, ((0, 0), (0, pad), (0, 0)))
        w_use = jnp.pad(w_nk, ((0, 0), (0, pad)))
        Kp = K + pad

    # M tile: either the full (small) spatial dim, or a 128-multiple tile; the
    # ragged last block (if any) is handled by Pallas padding/masked stores.
    TM = M if M <= m_tile else m_tile
    grid = (B, pl.cdiv(M, TM))

    scale2 = bn_scale.reshape(N, 1).astype(jnp.float32)
    bias2 = bn_bias.reshape(N, 1).astype(jnp.float32)

    itemsize = jnp.dtype(x.dtype).itemsize
    cost = pl.CostEstimate(
        flops=2 * B * M * Kp * N,
        transcendentals=B * M * N,                      # sigmoid exp
        bytes_accessed=int(B * Kp * M * itemsize        # activations in
                           + N * Kp * itemsize          # weight
                           + B * N * M * itemsize),     # output
    )

    out = pl.pallas_call(
        _focus_conv_kernel,
        out_shape=jax.ShapeDtypeStruct((B, N, M), x.dtype),
        grid=grid,
        in_specs=[
            pl.BlockSpec((None, Kp, TM), lambda b, i: (b, 0, i)),   # activations
            pl.BlockSpec((N, Kp), lambda b, i: (0, 0)),             # weight (pinned)
            pl.BlockSpec((N, 1), lambda b, i: (0, 0)),              # BN scale
            pl.BlockSpec((N, 1), lambda b, i: (0, 0)),              # BN bias
        ],
        out_specs=pl.BlockSpec((None, N, TM), lambda b, i: (b, 0, i)),
        compiler_params=pltpu.CompilerParams(
            dimension_semantics=("parallel", "parallel"),
        ),
        cost_estimate=cost,
    )(x_km, w_use, scale2, bias2)

    return out.reshape(B, N, Hh, Wh)                    # already NCHW, no transpose


def _reference(x, w_nk, bn_scale, bn_bias):
    """Pure-JAX reference of the same forward pass."""
    tl = x[..., ::2, ::2]
    tr = x[..., ::2, 1::2]
    bl = x[..., 1::2, ::2]
    br = x[..., 1::2, 1::2]
    xc = jnp.concatenate([tl, bl, tr, br], axis=1)
    y = jnp.einsum("bkhw,nk->bnhw", xc, w_nk)
    y = y * bn_scale[None, :, None, None] + bn_bias[None, :, None, None]
    return y * jax.nn.sigmoid(y)


def _make_params(key, c_in, c_out):
    """Deterministic Focus params (torch-layout conv weight + eval-mode BN), fused."""
    kw, kg, kb, km, kv = jax.random.split(key, 5)
    K = 4 * c_in
    w_torch = jax.random.normal(kw, (c_out, K, 1, 1), dtype=jnp.float32) * 0.1
    w_nk = w_torch[:, :, 0, 0]                                   # (N, K)
    gamma = 1.0 + 0.1 * jax.random.normal(kg, (c_out,), dtype=jnp.float32)
    beta = 0.1 * jax.random.normal(kb, (c_out,), dtype=jnp.float32)
    running_mean = 0.1 * jax.random.normal(km, (c_out,), dtype=jnp.float32)
    running_var = jnp.abs(1.0 + 0.1 * jax.random.normal(kv, (c_out,), dtype=jnp.float32))
    eps = 1e-5
    bn_scale = gamma / jnp.sqrt(running_var + eps)
    bn_bias = beta - running_mean * bn_scale
    return w_nk, bn_scale, bn_bias


if __name__ == "__main__":
    key = jax.random.PRNGKey(0)
    k1, k2, k3, k4 = jax.random.split(key, 4)

    # --- test 1: Focus(in_channels=4, out_channels=16), small spatial ---
    B, C, H, W = 2, 4, 16, 16
    C_out = 16
    x = jax.random.normal(k1, (B, C, H, W), dtype=jnp.float32)
    w_nk, bn_scale, bn_bias = _make_params(k2, C, C_out)

    out = focus_forward(x, w_nk, bn_scale, bn_bias)
    out = jax.block_until_ready(out)
    ref = _reference(x, w_nk, bn_scale, bn_bias)
    assert out.shape == (B, C_out, H // 2, W // 2), out.shape
    assert jnp.allclose(out, ref, atol=1e-4, rtol=1e-4), "mismatch vs reference (test 1)"

    # --- test 2: exercise the tiled grid + K-padding path (C=3 -> K=12, multi M-tile) ---
    B2, C2, H2, W2 = 2, 3, 32, 32
    C_out2 = 16
    x2 = jax.random.normal(k3, (B2, C2, H2, W2), dtype=jnp.float32)
    w2, s2, b2 = _make_params(k4, C2, C_out2)

    out2 = focus_forward(x2, w2, s2, b2, m_tile=128)     # M=256 -> grid=(2, 2)
    out2 = jax.block_until_ready(out2)
    ref2 = _reference(x2, w2, s2, b2)
    assert out2.shape == (B2, C_out2, H2 // 2, W2 // 2), out2.shape
    assert jnp.allclose(out2, ref2, atol=1e-4, rtol=1e-4), "mismatch vs reference (test 2)"

    print("KERNEL_OK")
</pallas_src>

<mosaic_0001>
module attributes {stable_mosaic.version = 11 : i64} {
  func.func @_focus_conv_kernel(%arg0: i32, %arg1: i32, %arg2: memref<1x16x64xf32, #tpu.memory_space<vmem>>, %arg3: memref<16x16xf32, #tpu.memory_space<vmem>>, %arg4: memref<16x1xf32, #tpu.memory_space<vmem>>, %arg5: memref<16x1xf32, #tpu.memory_space<vmem>>, %arg6: memref<1x16x64xf32, #tpu.memory_space<vmem>>) attributes {dimension_semantics = [#tpu.dimension_semantics<parallel>, #tpu.dimension_semantics<parallel>], iteration_bounds = array<i64: 2, 1>, scalar_prefetch = 0 : i64, scratch_operands = 0 : i64, tpu.core_type = #tpu.core_type<tc>, window_params = [{transform_indices = @transform_0, window_bounds = array<i64: 1, 16, 64>}, {pipeline_mode = #tpu.pipeline_mode<synchronous>, transform_indices = @transform_1, window_bounds = array<i64: 16, 16>}, {pipeline_mode = #tpu.pipeline_mode<synchronous>, transform_indices = @transform_2, window_bounds = array<i64: 16, 1>}, {pipeline_mode = #tpu.pipeline_mode<synchronous>, transform_indices = @transform_3, window_bounds = array<i64: 16, 1>}, {transform_indices = @transform_4, window_bounds = array<i64: 1, 16, 64>}]} {
    %c0 = arith.constant 0 : index
    %c0_0 = arith.constant 0 : index
    %0 = vector.load %arg3[%c0, %c0_0] : memref<16x16xf32, #tpu.memory_space<vmem>>, vector<16x16xf32>
    %c0_1 = arith.constant 0 : index
    %c0_2 = arith.constant 0 : index
    %c0_3 = arith.constant 0 : index
    %1 = vector.load %arg2[%c0_1, %c0_2, %c0_3] : memref<1x16x64xf32, #tpu.memory_space<vmem>>, vector<1x16x64xf32>
    %2 = vector.shape_cast %1 : vector<1x16x64xf32> to vector<16x64xf32>
    %cst = arith.constant dense<0.000000e+00> : vector<16x64xf32>
    %3 = tpu.matmul %0, %2, %cst {dimension_numbers = #tpu.dot_dimension_numbers<[1], [0], [0], [1], [0, 0, 1, 1], [], []>} : vector<16x16xf32>, vector<16x64xf32>, vector<16x64xf32> -> vector<16x64xf32>
    %c0_4 = arith.constant 0 : index
    %c0_5 = arith.constant 0 : index
    %4 = vector.load %arg4[%c0_4, %c0_5] : memref<16x1xf32, #tpu.memory_space<vmem>>, vector<16x1xf32>
    %5 = vector.broadcast %4 : vector<16x1xf32> to vector<16x64xf32>
    %6 = arith.mulf %3, %5 : vector<16x64xf32>
    %c0_6 = arith.constant 0 : index
    %c0_7 = arith.constant 0 : index
    %7 = vector.load %arg5[%c0_6, %c0_7] : memref<16x1xf32, #tpu.memory_space<vmem>>, vector<16x1xf32>
    %8 = vector.broadcast %7 : vector<16x1xf32> to vector<16x64xf32>
    %9 = arith.addf %6, %8 : vector<16x64xf32>
    %10 = arith.negf %9 : vector<16x64xf32>
    %11 = math.exp %10 : vector<16x64xf32>
    %cst_8 = arith.constant 1.000000e+00 : f32
    %12 = vector.broadcast %cst_8 : f32 to vector<16x64xf32>
    %13 = arith.addf %12, %11 : vector<16x64xf32>
    %14 = arith.divf %12, %13 : vector<16x64xf32>
    %15 = arith.mulf %9, %14 : vector<16x64xf32>
    %c0_9 = arith.constant 0 : index
    %c0_10 = arith.constant 0 : index
    %c0_11 = arith.constant 0 : index
    %16 = vector.load %arg6[%c0_9, %c0_10, %c0_11] : memref<1x16x64xf32, #tpu.memory_space<vmem>>, vector<1x16x64xf32>
    %17 = vector.shape_cast %16 : vector<1x16x64xf32> to vector<16x64xf32>
    %18 = vector.shape_cast %15 : vector<16x64xf32> to vector<1x16x64xf32>
    tpu.vector_store %arg6[%c0_9, %c0_10, %c0_11], %18 {strides = array<i32>} : memref<1x16x64xf32, #tpu.memory_space<vmem>>, vector<1x16x64xf32>,
    return
  }
  func.func @transform_0(%arg0: i32, %arg1: i32) -> (i32, i32, i32) {
    %c0_i32 = arith.constant 0 : i32
    %c0_i32_0 = arith.constant 0 : i32
    return %arg0, %c0_i32, %arg1 : i32, i32, i32
  }
  func.func @transform_1(%arg0: i32, %arg1: i32) -> (i32, i32) {
    %c0_i32 = arith.constant 0 : i32
    %c0_i32_0 = arith.constant 0 : i32
    %c0_i32_1 = arith.constant 0 : i32
    return %c0_i32, %c0_i32_0 : i32, i32
  }
  func.func @transform_2(%arg0: i32, %arg1: i32) -> (i32, i32) {
    %c0_i32 = arith.constant 0 : i32
    %c0_i32_0 = arith.constant 0 : i32
    %c0_i32_1 = arith.constant 0 : i32
    return %c0_i32, %c0_i32_0 : i32, i32
  }
  func.func @transform_3(%arg0: i32, %arg1: i32) -> (i32, i32) {
    %c0_i32 = arith.constant 0 : i32
    %c0_i32_0 = arith.constant 0 : i32
    %c0_i32_1 = arith.constant 0 : i32
    return %c0_i32, %c0_i32_0 : i32, i32
  }
  func.func @transform_4(%arg0: i32, %arg1: i32) -> (i32, i32, i32) {
    %c0_i32 = arith.constant 0 : i32
    %c0_i32_0 = arith.constant 0 : i32
    return %arg0, %c0_i32, %arg1 : i32, i32, i32
  }
}

</mosaic_0001>

<bundles_post_ra>
// kernel: tpu_custom_call.1
= control target key start
LH: loop header
LB: loop body
LE: loop exit
PB: predicated region body
PF: predicated region fallthrough
CT: control target
= control target key end

     0   :  { %9 = vsyncpa [#allocation3], 0  ;;  %s900_s0 = inlined_call_operand.vmem [shape: f32[2,16,64], index: 0, kind: input, shape index: {}]   ;;  %s901_s1 = inlined_call_operand.hbm [shape: f32[16,16], index: 1, kind: input, shape index: {}]   ;;  %s902_s2 = inlined_call_operand.vmem [shape: f32[16,1], index: 2, kind: input, shape index: {}]   ;;  %s903_s3 = inlined_call_operand.vmem [shape: f32[16,1], index: 3, kind: input, shape index: {}]   ;;  %s904_s4 = inlined_call_operand.hbm [shape: f32[2,16,64], index: 4, kind: output, shape index: {}]  }
   0x1   :  { %10 = vsyncpa [#allocation4], 0 }
   0x2   :  { %12 = vsyncpa [#allocation4 + $0x1], 0  ;;  %s733_s15 = smov 0   ;;  %s735_s16 = smov 0  }
   0x3   :  { %s737_s17 = smov 0   ;;  %s739_s18 = smov 0  }
   0x4   :  { %s741_s19 = smov 0   ;;  %s743_s20 = smov 0  }
   0x5 LB: > { %s472_s21 = sadd.s32 4294967295, %s699_s20   ;;  %s473_s22 = sadd.s32 4294967294, %s699_s20   ;;  %s699_s20 = sphi %s743_s20, %s18_s20   ;;  %s695_s19 = sphi %s741_s19, %s922_s19   ;;  %s691_s18 = sphi %s739_s18, %s921_s18   ;;  %s687_s17 = sphi %s737_s17, %s920_s17   ;;  %s683_s16 = sphi %s735_s16, %s919_s16   ;;  %s679_s15 = sphi %s733_s15, %s918_s15  }
   0x6   : > { %s30_s23 = sadd.s32 1, %s695_s19  ;;  %s130_s24 = sadd.s32 1, %s687_s17 }
   0x7   : > { %p32_p0 = scmp.ge.s32.totalorder %s30_s23, 2  ;;  %p140_p1 = scmp.ne.s32.totalorder %s687_s17, %s683_s16 }
   0x8   : > { %p141_p2 = scmp.eq.s32.totalorder %s472_s21, 1  ;;  %p146_p3 = scmp.ne.s32.totalorder %s683_s16, %s679_s15 }
   0x9   : > { %s924_s23 = smov (%p32_p0, %s30_s23), 0  ;;  %p147_p5 = scmp.eq.s32.totalorder %s473_s22, 1 }
   0xa   : > { %p773_p4 = por %p141_p2, %p140_p1  ;;  %s125_s26 = ssub.s32 %s695_s19, %s924_s23 }
   0xb   : > { %p474_p6 = scmp.ge.s32.totalorder %s699_s20, 1  ;;  %p128_p7 = scmp.eq.s32.totalorder %s125_s26, 0 }
   0xc   : > { %s909_s25 = scalar_select %p773_p4, 1, 0 }
   0xd   : > { %p780_p8 = por %p147_p5, %p146_p3  ;;  %p154_p9 = scmp.lt.s32.totalorder %s699_s20, 3 }
   0xe   : > { %s786_s28 = scalar_select %p128_p7, %s687_s17, %s130_s24  }
   0xf   : > { %s910_s27 = scalar_select %p780_p8, 1, 0 }
  0x10   : > { %p788_p10 = pnand %p474_p6, %p154_p9  ;;  %p792_p11 = scmp.eq.s32.totalorder %s472_s21, 0 }
  0x11   : > { %s701_s5 = smov [#allocation2]   ;;  %s589_s10 = scalar_lea.hbm %s901_s1, 256 }
  0x12   : > { %s911_s29 = scalar_select %p788_p10, 1, 0 }
  0x13   : > { %s912_s30 = scalar_select %p792_p11, 1, 0 }
  0x14   : > { %p514_p12 = pneg %p788_p10  ;;  %s166_s6 = sshll.u32 %s701_s5, 4  ;;  %s167_s6 = int_to_ptr.vmem [resolvable:$true] %s166_s6 }
  0x15   : > { %p590_p0 = scmp.ne.s32.totalorder %s901_s1, %s589_s10  ;;  %p596_p5 = scmp.lt.u32.totalorder %s589_s10, %s901_s1 }
  0x16   : > { %p800_p13 = pnand %p792_p11, %p514_p12 }
  0x18   : > { %p591_p1 = pneg %p800_p13 }
  0x1a   : > { %p592_p2 = pnand %p591_p1, %p590_p0 }
  0x1c   : > { %p593_p3 = pneg %p592_p2 }
  0x1e   : > { %p598_p6 = pnand %p596_p5, %p593_p3 }
  0x20   : > { %601 = shalt.err (!%p598_p6)
}
  0x21   : > { %s602_s21 = scalar_lea.vmem %s167_s6, 256  ;;  %p610_p8 = scmp.lt.s32.totalorder %s167_s6, %s167_s6 }
  0x22   : > { %p603_p7 = scmp.ne.s32.totalorder %s167_s6, %s602_s21  ;;  %p611_p4 = scmp.lt.s32.totalorder %s602_s21, %s602_s21 }
  0x24   : > { %p605_p9 = pnand %p603_p7, %p591_p1  ;;  %p612_p11 = por %p611_p4, %p610_p8 }
  0x26   : > { %p606_p12 = pneg %p605_p9 }
  0x28   : > { %p613_p10 = pnand %p612_p11, %p606_p12 }
  0x2a   : > { %616 = shalt.err (!%p613_p10)
}
  0x2b   : > { %s702_s22 = smov 128   ;;  %s703_s24 = smov 8  }
  0x2c   : > { %517 = dma.hbm_to_vmem [thread:$0]  (!%p800_p13), %s901_s1, 256, %s167_s6, [#allocation3], %s702_s22, %s702_s22, %s703_s24  }
  0x2d   : > { %p914_p0 = scmp.ne.s32.totalorder %s911_s29, 0 }
  0x2e   : > { %p915_p2 = scmp.ne.s32.totalorder (!%p914_p0), %s912_s30, 0 }
  0x2f   : > { %199 = sbr.rel (%p914_p0) target bundleno = 328 (0x148), region = 36 }
  0x36   : > { %670 = dma.done.wait (%p915_p2), [#allocation3], 256  }
  0x37   : > { %672 = vsyncadd (%p915_p2), [#allocation3], 4294967040  ;;  %p228_p4 = scmp.lt.s32.totalorder %s691_s18, 1  ;;  %v704_v0 = vmov 0   ;;  %vm240_vm0 = vcmask 130048   ;;  %v236_v3 = vld [vmem:[#allocation2] sm:$0xff] }
  0x38   : > { %579 = vset.pattern.permute.xlu0 %v704_v0  ;;  %580 = vset.pattern.permute.xlu1 %v704_v0  ;;  %v322_v5 = vld [vmem:[%s902_s2] sm:$0xff]  ;;  %v323_v7 = vld [vmem:[%s902_s2 + $0x8] sm:$0xff]  ;;  %s225_s24 = sand.u32 1, %s683_s16   ;;  %s492_s5 = sshll.u32 %s691_s18, 8  ;;  %vm364_vm1 = vcmask 523264  }
  0x39   : > { %s229_s7 = scalar_select %p228_p4, %s691_s18, 1  ;;  %501 = vmatprep.mubr.msk.f32.mxu0 %vm240_vm0, %v236_v3  ;;  %v336_v6 = vld [vmem:[%s903_s3] sm:$0xff]  ;;  %326 = vperm.xlu0 %579, %v322_v5   ;;  %v337_v8 = vld [vmem:[%s903_s3 + $0x8] sm:$0xff] }
  0x3a   : > { %340 = vperm.xlu1 %580, %v336_v6   ;;  %v237_v9 = vld [vmem:[#allocation2 + $0x8] sm:$0xff]  ;;  %s479_s26 = sshll.u32 %s225_s24, 4  ;;  %s854_s18 = scalar_lea.sflag [#allocation4], %s225_s24 }
  0x3b   : > { %s491_s8 = sshll.u32 %s229_s7, 4  ;;  %s227_s7 = scalar_lea.vmem [#allocation5], %s479_s26 }
  0x3c   : > { %s235_s6 = scalar_lea.vmem %s900_s0, %s491_s8  ;;  %s382_s8 = sshll.u32 %s227_s7, 4  ;;  %s852_s8 = int_to_ptr.vmem [resolvable:$true] %s382_s8 }
  0x3d   : > { %v238_v1 = vld [vmem:[%s235_s6] sm:$0xff]  ;;  %v239_v2 = vld [vmem:[%s235_s6 + $0x8] sm:$0xff]  ;;  %331 = vperm.xlu0 %579, %v323_v7   ;;  %s850_s6 = scalar_lea.hbm %s904_s4, %s492_s5  ;;  %s617_s29 = scalar_lea.vmem %s852_s8, 256 }
  0x3e   : > { %v504_v4 = vpack.c.bf16 %v239_v2, %v238_v1  ;;  %345 = vperm.xlu1 %580, %v337_v8   ;;  %p618_p8 = scmp.ne.s32.totalorder %s852_s8, %s617_s29  ;;  %p916_p10 = scmp.ne.s32.totalorder %s909_s25, 0 }
  0x3f   : > { %s705_s30 = smov [#allocation5]  }
  0x40   : > { %505 = vmatprep.subr.bf16.mxu0 %v504_v4  ;;  %p619_p11 = pnand %p618_p8, %p916_p10  ;;  %s621_s11 = sshll.u32 %s705_s30, 4  ;;  %s622_s11 = int_to_ptr.vmem [resolvable:$false] %s621_s11 }
  0x41   : > { %507 = vmatpush3.bf16.msra.mxu0 %v504_v4  ;;  %s623_s12 = scalar_lea.vmem %s622_s11, 512  ;;  %p624_p1 = scmp.lt.s32.totalorder %s852_s8, %s622_s11 }
  0x42   : > { %p620_p13 = pneg %p619_p11  ;;  %p625_p3 = scmp.lt.s32.totalorder %s623_s12, %s617_s29 }
  0x44   : > { %502 = vmatmul.mubr.msk.f32.vlgmr.msra.gmra.mrb[0].mxu0 %vm240_vm0, %v237_v9  ;;  %p626_p5 = por %p625_p3, %p624_p1 }
  0x46   : > { %p627_p6 = pnand %p626_p5, %p620_p13 }
  0xb8   : > { %v327_v10 = vpop.permute.xlu0 %326 }
  0xb9   : > { %v341_v11 = vpop.permute.xlu1 %340 }
  0xbc   : > { %v332_v12 = vpop.permute.xlu0 %331 }
  0xbd   : > { %v346_v16 = vpop.permute.xlu1 %345 }
 0x117   : > { %v503_v13 = vpop.f32.mrb[0].mxu0 }
 0x118   : > { %v335_v14 = vmul.f32 %v503_v13, %v332_v12  ;;  %v313_v15 = vpop.f32.mrb[1].mxu0 }
 0x119   : > { %v334_v17 = vmul.f32 %v327_v10, %v313_v15 }
 0x11a   : > { %v349_v18 = vadd.f32 %v346_v16, %v335_v14 }
 0x11b   : > { %v348_v19 = vadd.f32 %v341_v11, %v334_v17 }
 0x11c   : > { %v485_v20 = vmul.f32 -1.442695, %v349_v18 }
 0x11d   : > { %v484_v21 = vmul.f32 -1.442695, %v348_v19 }
 0x11e   : > { %581 = vpow2.f32 %v485_v20 }
 0x11f   : > { %583 = vpow2.f32 %v484_v21 }
 0x128   : > { %v582_v22 = vpop.eup %581 }
 0x129   : > { %v584_v23 = vpop.eup %583  ;;  %v357_v24 = vadd.f32 1.0, %v582_v22 }
 0x12a   : > { %v356_v25 = vadd.f32 1.0, %v584_v23 }
 0x12b   : > { %585 = vrcp.f32 %v357_v24 }
 0x12c   : > { %587 = vrcp.f32 %v356_v25 }
 0x135   : > { %v586_v26 = vpop.eup %585 }
 0x136   : > { %v588_v27 = vpop.eup %587  ;;  %v363_v28 = vmul.f32 %v586_v26, %v349_v18 }
 0x137   : > { %v362_v29 = vmul.f32 %v588_v27, %v348_v19 }
 0x138   : > { %366 = vst.msk [vmem:[%s227_s7 + $0x8] sm:$0xff] %vm364_vm1, %v363_v28 }
 0x139   : > { %365 = vst.msk [vmem:[%s227_s7] sm:$0xff] %vm364_vm1, %v362_v29 }
 0x13a   : > { %630 = shalt.err (!%p627_p6)
}
 0x13b   : > { %s631_s13 = scalar_lea.hbm %s850_s6, 256  ;;  %s635_s22 = scalar_lea.hbm %s904_s4, 512 }
 0x13c   : > { %p632_p7 = scmp.ne.s32.totalorder %s850_s6, %s631_s13  ;;  %p636_p0 = scmp.lt.u32.totalorder %s850_s6, %s904_s4 }
 0x13d   : > { %p637_p2 = scmp.lt.u32.totalorder %s635_s22, %s631_s13  ;;  %p639_p8 = scmp.lt.u32.totalorder %s631_s13, %s850_s6 }
 0x13e   : > { %p633_p9 = pnand %p632_p7, %p916_p10 }
 0x13f   : > { %p638_p4 = por %p637_p2, %p636_p0 }
 0x140   : > { %p634_p12 = pneg %p633_p9 }
 0x141   : > { %p640_p11 = por %p639_p8, %p638_p4 }
 0x143   : > { %p641_p13 = pnand %p640_p11, %p634_p12 }
 0x145   : > { %644 = shalt.err (!%p641_p13)
}
 0x146   : > { %s706_s5 = smov 128   ;;  %s707_s7 = smov 8  }
 0x147   : > { %512 = dma.vmem_to_hbm [thread:$0]  (%p916_p10), %s852_s8, 256, %s850_s6, %s854_s18, %s706_s5, %s706_s5, %s707_s7  }
 0x148 PF: > { %p524_p1 = scmp.ge.s32.totalorder %s699_s20, 2  ;;  %s397_s9 = sand.u32 1, %s679_s15  }
 0x149   : > { %p917_p3 = scmp.ne.s32.totalorder %s910_s27, 0  ;;  %s398_s10 = scalar_lea.sflag [#allocation4], %s397_s9 }
 0x14b   : > { %p519_p5 = pnand %p524_p1, %p917_p3 }
 0x14d   : > { %674 = dma.done.wait (!%p519_p5), %s398_s10, 256  }
 0x14e   : > { %676 = vsyncadd (!%p519_p5), %s398_s10, 4294967040  ;;  %s18_s20 = sadd.s32 1, %s699_s20   ;;  %s918_s15 = smov %s683_s16 }
 0x14f   : > { %p15_p6 = scmp.ge.s32.totalorder %s18_s20, 4   ;;  %s919_s16 = smov %s687_s17 }
 0x150   : > { %s920_s17 = smov %s786_s28  ;;  %s921_s18 = smov %s695_s19 }
 0x151   : > { %s922_s19 = smov %s924_s23  ;;  %17 = sbr.rel (!%p15_p6) target bundleno = 5 (0x5), region = 76 }
 0x158   :  { %403 = vsyncpa [#allocation3], 1 }
 0x159   :  { %405 = vsyncpa [#allocation3 + $0x1], 1 }
 0x15a   :  { %406 = vsyncpa [#allocation4], 1 }
 0x15b   :  { %408 = vsyncpa [#allocation4 + $0x1], 1 }

</bundles_post_ra>
